<compile_context>
chip_gen: v7x
topology: tpu7x:2x2x1
jax: 0.10.0
libtpu: 0.0.40
codegen_flags: <defaults>
</compile_context>

<pallas_src>
import functools

import jax
import jax.numpy as jnp
from jax.experimental import pallas as pl
from jax.experimental.pallas import tpu as pltpu

NEG_SLOPE = 0.02          # LeakyReLU(0.02)
LN_EPS = 1e-5             # nn.LayerNorm default eps
PAD = 128                 # lane width (keep 128; padding to 256 buys nothing)
MAX_TILE_B = 2048         # v7x-safe batch-tile cap (64 MiB VMEM)


def _round_up(n, m):
    return ((n + m - 1) // m) * m


# --------------------------- shared forward math -----------------------------


def _forward_math(h, get_w, get_vec, meta, approx_recip=False):
    """Runs the whole (fused) network on a value `h` of shape (rows, in_ch).

    `get_w(layer_idx)` returns the (padded, bf16) weight; `get_vec(row, width)`
    returns a (1, width) f32 slice of the packed bias/gamma/beta stack.  Used
    by both the Pallas kernel body and the pure-JAX reference, so the two are
    the same math by construction.
    """
    vrow = 0
    for li, (kind, n_true, n_pad) in enumerate(meta):
        w = get_w(li)
        b = get_vec(vrow, n_pad)
        vrow += 1
        # bf16 x bf16 -> f32 accumulate on the MXU; bias add in f32.
        h = jnp.dot(h.astype(w.dtype), w,
                    preferred_element_type=jnp.float32) + b
        if kind == "block":
            g = get_vec(vrow, n_pad)
            bb = get_vec(vrow + 1, n_pad)
            vrow += 2
            if n_pad == n_true:
                # Unpadded layer: centered variance (matches PyTorch and
                # avoids E[x^2]-mu^2 cancellation).
                mu = jnp.mean(h, axis=-1, keepdims=True)
                d = h - mu
                var = jnp.mean(d * d, axis=-1, keepdims=True)
            else:
                # Padded lanes are exactly 0 pre-LN, so full-width sums
                # divided by the true feature count are exact.
                inv_n = jnp.float32(1.0 / n_true)
                mu = jnp.sum(h, axis=-1, keepdims=True) * inv_n
                ex2 = jnp.sum(h * h, axis=-1, keepdims=True) * inv_n
                var = ex2 - mu * mu
                d = h - mu
            h = d * jax.lax.rsqrt(var + LN_EPS)
            h = h * g + bb                              # padded lanes -> 0
            h = jnp.where(h >= 0.0, h, NEG_SLOPE * h)   # LeakyReLU(0.02)

    # nn.Softmax() picks dim=1 for 2-D input -> feature axis.  The last
    # layer's fan_out is unpadded, so no masking is needed.
    m = jnp.max(h, axis=-1, keepdims=True)
    e = jnp.exp(h - m)
    denom = jnp.sum(e, axis=-1, keepdims=True)
    if approx_recip:
        # Opt-in EUP reciprocal: faster, but rows sum to 1 only to ~1e-3.
        return e * pl.reciprocal(denom, approx=True)
    return e / denom


# ------------------------------- kernel --------------------------------------


def _make_kernel(meta, approx_recip):
    n_weights = len(meta)

    def kernel(x_ref, *refs):
        w_refs = refs[:n_weights]
        vec_ref = refs[n_weights]
        out_ref = refs[n_weights + 1]
        out = _forward_math(
            x_ref[...],
            get_w=lambda i: w_refs[i][...],
            get_vec=lambda r, w: vec_ref[r:r + 1, :w],
            meta=meta,
            approx_recip=approx_recip,
        )
        out_ref[...] = out.astype(out_ref.dtype)

    return kernel


# ----------------------------- parameters ------------------------------------


def _layer_plan(in_channel, lat_dim, hls):
    """Mirror the PyTorch module's layer construction (encoder + decoder)."""
    plan = [("block", in_channel, hls[0])]
    for i in range(len(hls) - 1):
        plan.append(("block", hls[i], hls[i + 1]))
    plan.append(("linear", hls[-1], lat_dim))
    plan.append(("block", lat_dim, hls[-1]))
    for i in range(len(hls) - 1, 0, -1):
        plan.append(("block", hls[i], hls[i - 1]))
    plan.append(("linear", hls[0], in_channel))
    return plan


def init_params(key, in_channel, lat_dim, hls, matmul_dtype=jnp.bfloat16):
    """Deterministic init mimicking nn.Linear (uniform +-1/sqrt(fan_in)) and
    nn.LayerNorm (gamma=1, beta=0), then:
      * fuse the encoder's last Linear with the decoder's first Linear,
      * zero-pad hidden feature dims to multiples of 128 (first fan_in and
        last fan_out keep their true sizes),
      * pack all biases/gammas/betas into one (n_vec, max_width) f32 stack.
    Returns (weights: list of bf16 arrays, vec_stack: f32, meta)."""
    plan = _layer_plan(in_channel, lat_dim, hls)
    raw = []
    for kind, fan_in, fan_out in plan:
        key, kw, kb = jax.random.split(key, 3)
        bound = 1.0 / float(fan_in) ** 0.5
        w = jax.random.uniform(kw, (fan_in, fan_out), jnp.float32, -bound, bound)
        b = jax.random.uniform(kb, (fan_out,), jnp.float32, -bound, bound)
        if kind == "block":
            g = jnp.ones((fan_out,), jnp.float32)
            be = jnp.zeros((fan_out,), jnp.float32)
        else:
            g = be = None
        raw.append([kind, w, b, g, be])

    # Fuse encoder-last Linear (hls[-1]->lat) with decoder-first Linear
    # (lat->hls[-1]) in f32: y = (x@W1+b1)@W2+b2 = x@(W1@W2) + (b1@W2 + b2).
    # No activation sits between them, so this is exact (up to one bf16 cast).
    i_lin = len(hls)
    _, w1, b1, _, _ = raw[i_lin]
    _, w2, b2, g2, be2 = raw[i_lin + 1]
    raw = (raw[:i_lin]
           + [["block", w1 @ w2, b1 @ w2 + b2, g2, be2]]
           + raw[i_lin + 2:])

    n_layers = len(raw)
    out_pads = []
    for li, entry in enumerate(raw):
        fo = entry[1].shape[1]
        out_pads.append(fo if li == n_layers - 1 else _round_up(fo, PAD))
    max_w = max(out_pads)

    weights, vec_rows, meta = [], [], []
    prev_pad = in_channel                      # first fan_in stays unpadded
    for li, (kind, w, b, g, be) in enumerate(raw):
        fi, fo = w.shape
        fo_pad = out_pads[li]
        w_p = jnp.zeros((prev_pad, fo_pad), jnp.float32).at[:fi, :fo].set(w)
        weights.append(w_p.astype(matmul_dtype))
        vec_rows.append(jnp.zeros((max_w,), jnp.float32).at[:fo].set(b))
        if kind == "block":
            vec_rows.append(jnp.zeros((max_w,), jnp.float32).at[:fo].set(g))
            vec_rows.append(jnp.zeros((max_w,), jnp.float32).at[:fo].set(be))
        meta.append((kind, fo, fo_pad))
        prev_pad = fo_pad
    vec_stack = jnp.stack(vec_rows)            # (n_vec, max_w) f32
    return weights, vec_stack, tuple(meta)


# ------------------------------- wrapper --------------------------------------


@functools.partial(jax.jit,
                   static_argnames=("meta", "tile_b", "out_dtype", "approx_recip"))
def autoencoder_forward(x, weights, vec_stack, meta, tile_b=1024,
                        out_dtype=jnp.float32, approx_recip=False):
    """x: (B, in_channel) -> softmax reconstruction (B, in_channel)."""
    B, C = x.shape
    c_out = meta[-1][1]                        # true in_channel (== C)

    # Batch tile: large (amortize ~0.35us per-step overhead), capped for v7x
    # VMEM, and clamped so the grid has >= 2 steps for megacore sharding.
    tb = min(int(tile_b), MAX_TILE_B, _round_up(-(-B // 2), 8))
    tb = _round_up(max(tb, 8), 8)
    b_pad = _round_up(B, tb)

    x_p = x.astype(jnp.bfloat16)               # halve input HBM traffic
    if b_pad != B:
        x_p = jnp.pad(x_p, ((0, b_pad - B), (0, 0)))

    kernel = _make_kernel(meta, approx_recip)

    x_spec = pl.BlockSpec((tb, C), lambda i: (i, 0))
    w_specs = [pl.BlockSpec(w.shape, lambda i: (0, 0)) for w in weights]
    v_spec = pl.BlockSpec(vec_stack.shape, lambda i: (0, 0))
    out_spec = pl.BlockSpec((tb, c_out), lambda i: (i, 0))

    # VMEM budget from the actual tile working set (double-buffered I/O,
    # resident params, f32 working activations) + headroom; capped below the
    # v7x 64 MiB physical size.
    itemsize_out = jnp.dtype(out_dtype).itemsize
    max_w = max(m[2] for m in meta)
    param_bytes = sum(int(w.size) * w.dtype.itemsize for w in weights)
    param_bytes += int(vec_stack.size) * vec_stack.dtype.itemsize
    est = (2 * tb * C * 2 + 2 * tb * c_out * itemsize_out
           + 2 * param_bytes + 4 * tb * max_w * 4)
    vmem_limit = int(min(max(int(est * 1.5) + (4 << 20), 32 << 20), 56 << 20))

    out = pl.pallas_call(
        kernel,
        out_shape=jax.ShapeDtypeStruct((b_pad, c_out), out_dtype),
        grid_spec=pltpu.PrefetchScalarGridSpec(
            num_scalar_prefetch=0,
            grid=(b_pad // tb,),
            in_specs=[x_spec] + w_specs + [v_spec],
            out_specs=out_spec,
        ),
        compiler_params=pltpu.CompilerParams(
            dimension_semantics=("parallel",),   # megacore-shardable axis
            vmem_limit_bytes=vmem_limit,
        ),
    )(x_p, *weights, vec_stack)

    return out[:B] if b_pad != B else out


def reference_forward(x, weights, vec_stack, meta):
    """Pure-JAX reference doing the identical (fused, bf16-matmul) math."""
    h = x.astype(jnp.bfloat16)
    return _forward_math(
        h,
        get_w=lambda i: weights[i],
        get_vec=lambda r, w: vec_stack[r:r + 1, :w],
        meta=meta,
        approx_recip=False,
    )


# --------------------------------- main ---------------------------------------


if __name__ == "__main__":
    # Small shapes consistent with the module (it operates on 2-D (B, C)).
    IN_CHANNEL = 32
    LAT_DIM = 2
    HLS = (128, 64, 32)
    BATCH = 50      # ragged on purpose: exercises batch padding + multi-step grid
    TILE_B = 16     # small tile for the tiny test; production default is 1024

    key = jax.random.PRNGKey(0)
    key, kx = jax.random.split(key)
    x = jax.random.normal(kx, (BATCH, IN_CHANNEL), jnp.float32)

    weights, vec_stack, meta = init_params(key, IN_CHANNEL, LAT_DIM, HLS)

    out = autoencoder_forward(x, weights, vec_stack, meta=meta, tile_b=TILE_B)
    out = jax.block_until_ready(out)

    ref = reference_forward(x, weights, vec_stack, meta)

    assert out.shape == (BATCH, IN_CHANNEL)
    assert bool(jnp.all(jnp.isfinite(out)))
    assert jnp.allclose(out, ref, atol=2e-3, rtol=2e-3), "mismatch vs reference"
    # Exact softmax divide -> rows sum to 1 to f32 precision.
    assert jnp.allclose(jnp.sum(out, axis=-1), 1.0, atol=2e-3)

    print("KERNEL_OK")
</pallas_src>

<mosaic_0001>
module attributes {stable_mosaic.version = 11 : i64} {
  func.func @kernel(%arg0: i32, %arg1: memref<16x32xbf16, #tpu.memory_space<vmem>>, %arg2: memref<32x128xbf16, #tpu.memory_space<vmem>>, %arg3: memref<128x128xbf16, #tpu.memory_space<vmem>>, %arg4: memref<128x128xbf16, #tpu.memory_space<vmem>>, %arg5: memref<128x128xbf16, #tpu.memory_space<vmem>>, %arg6: memref<128x128xbf16, #tpu.memory_space<vmem>>, %arg7: memref<128x128xbf16, #tpu.memory_space<vmem>>, %arg8: memref<128x32xbf16, #tpu.memory_space<vmem>>, %arg9: memref<19x128xf32, #tpu.memory_space<vmem>>, %arg10: memref<16x32xf32, #tpu.memory_space<vmem>>) attributes {dimension_semantics = [#tpu.dimension_semantics<parallel>], iteration_bounds = array<i64: 4>, scalar_prefetch = 0 : i64, scratch_operands = 0 : i64, tpu.core_type = #tpu.core_type<tc>, window_params = [{transform_indices = @transform_0, window_bounds = array<i64: 16, 32>}, {pipeline_mode = #tpu.pipeline_mode<synchronous>, transform_indices = @transform_1, window_bounds = array<i64: 32, 128>}, {pipeline_mode = #tpu.pipeline_mode<synchronous>, transform_indices = @transform_2, window_bounds = array<i64: 128, 128>}, {pipeline_mode = #tpu.pipeline_mode<synchronous>, transform_indices = @transform_3, window_bounds = array<i64: 128, 128>}, {pipeline_mode = #tpu.pipeline_mode<synchronous>, transform_indices = @transform_4, window_bounds = array<i64: 128, 128>}, {pipeline_mode = #tpu.pipeline_mode<synchronous>, transform_indices = @transform_5, window_bounds = array<i64: 128, 128>}, {pipeline_mode = #tpu.pipeline_mode<synchronous>, transform_indices = @transform_6, window_bounds = array<i64: 128, 128>}, {pipeline_mode = #tpu.pipeline_mode<synchronous>, transform_indices = @transform_7, window_bounds = array<i64: 128, 32>}, {pipeline_mode = #tpu.pipeline_mode<synchronous>, transform_indices = @transform_8, window_bounds = array<i64: 19, 128>}, {transform_indices = @transform_9, window_bounds = array<i64: 16, 32>}]} {
    %c0 = arith.constant 0 : index
    %c0_0 = arith.constant 0 : index
    %0 = vector.load %arg1[%c0, %c0_0] : memref<16x32xbf16, #tpu.memory_space<vmem>>, vector<16x32xbf16>
    %c0_1 = arith.constant 0 : index
    %c0_2 = arith.constant 0 : index
    %1 = vector.load %arg2[%c0_1, %c0_2] : memref<32x128xbf16, #tpu.memory_space<vmem>>, vector<32x128xbf16>
    %c0_3 = arith.constant 0 : index
    %c0_4 = arith.constant 0 : index
    %2 = vector.load %arg9[%c0_3, %c0_4] : memref<19x128xf32, #tpu.memory_space<vmem>>, vector<1x128xf32>
    %cst = arith.constant dense<0.000000e+00> : vector<16x128xf32>
    %3 = tpu.matmul %0, %1, %cst {dimension_numbers = #tpu.dot_dimension_numbers<[1], [0], [0], [1], [0, 0, 1, 1], [], []>} : vector<16x32xbf16>, vector<32x128xbf16>, vector<16x128xf32> -> vector<16x128xf32>
    %4 = vector.broadcast %2 : vector<1x128xf32> to vector<16x128xf32>
    %5 = arith.addf %3, %4 : vector<16x128xf32>
    %c1 = arith.constant 1 : index
    %c0_5 = arith.constant 0 : index
    %6 = vector.load %arg9[%c1, %c0_5] : memref<19x128xf32, #tpu.memory_space<vmem>>, vector<1x128xf32>
    %c2 = arith.constant 2 : index
    %c0_6 = arith.constant 0 : index
    %7 = vector.load %arg9[%c2, %c0_6] : memref<19x128xf32, #tpu.memory_space<vmem>>, vector<1x128xf32>
    %cst_7 = arith.constant dense<0.000000e+00> : vector<16xf32>
    %8 = vector.multi_reduction <add>, %5, %cst_7 [1] : vector<16x128xf32> to vector<16xf32>
    %9 = vector.shape_cast %8 : vector<16xf32> to vector<16x1xf32>
    %cst_8 = arith.constant 1.280000e+02 : f32
    %10 = vector.broadcast %cst_8 : f32 to vector<16x1xf32>
    %11 = arith.divf %9, %10 : vector<16x1xf32>
    %12 = vector.broadcast %11 : vector<16x1xf32> to vector<16x128xf32>
    %13 = arith.subf %5, %12 : vector<16x128xf32>
    %14 = arith.mulf %13, %13 : vector<16x128xf32>
    %cst_9 = arith.constant dense<0.000000e+00> : vector<16xf32>
    %15 = vector.multi_reduction <add>, %14, %cst_9 [1] : vector<16x128xf32> to vector<16xf32>
    %16 = vector.shape_cast %15 : vector<16xf32> to vector<16x1xf32>
    %cst_10 = arith.constant 1.280000e+02 : f32
    %17 = vector.broadcast %cst_10 : f32 to vector<16x1xf32>
    %18 = arith.divf %16, %17 : vector<16x1xf32>
    %cst_11 = arith.constant 9.99999974E-6 : f32
    %19 = vector.broadcast %cst_11 : f32 to vector<16x1xf32>
    %20 = arith.addf %18, %19 : vector<16x1xf32>
    %21 = math.rsqrt %20 : vector<16x1xf32>
    %22 = vector.broadcast %21 : vector<16x1xf32> to vector<16x128xf32>
    %23 = arith.mulf %13, %22 : vector<16x128xf32>
    %24 = vector.broadcast %6 : vector<1x128xf32> to vector<16x128xf32>
    %25 = arith.mulf %23, %24 : vector<16x128xf32>
    %26 = vector.broadcast %7 : vector<1x128xf32> to vector<16x128xf32>
    %27 = arith.addf %25, %26 : vector<16x128xf32>
    %cst_12 = arith.constant 0.000000e+00 : f32
    %28 = vector.broadcast %cst_12 : f32 to vector<16x128xf32>
    %29 = arith.cmpf oge, %27, %28 : vector<16x128xf32>
    %cst_13 = arith.constant 2.000000e-02 : f32
    %30 = vector.broadcast %cst_13 : f32 to vector<16x128xf32>
    %31 = arith.mulf %30, %27 : vector<16x128xf32>
    %32 = arith.select %29, %27, %31 : vector<16x128xi1>, vector<16x128xf32>
    %c0_14 = arith.constant 0 : index
    %c0_15 = arith.constant 0 : index
    %33 = vector.load %arg3[%c0_14, %c0_15] : memref<128x128xbf16, #tpu.memory_space<vmem>>, vector<128x128xbf16>
    %c3 = arith.constant 3 : index
    %c0_16 = arith.constant 0 : index
    %34 = vector.load %arg9[%c3, %c0_16] : memref<19x128xf32, #tpu.memory_space<vmem>>, vector<1x128xf32>
    %35 = arith.truncf %32 : vector<16x128xf32> to vector<16x128xbf16>
    %cst_17 = arith.constant dense<0.000000e+00> : vector<16x128xf32>
    %36 = tpu.matmul %35, %33, %cst_17 {dimension_numbers = #tpu.dot_dimension_numbers<[1], [0], [0], [1], [0, 0, 1, 1], [], []>} : vector<16x128xbf16>, vector<128x128xbf16>, vector<16x128xf32> -> vector<16x128xf32>
    %37 = vector.broadcast %34 : vector<1x128xf32> to vector<16x128xf32>
    %38 = arith.addf %36, %37 : vector<16x128xf32>
    %c4 = arith.constant 4 : index
    %c0_18 = arith.constant 0 : index
    %39 = vector.load %arg9[%c4, %c0_18] : memref<19x128xf32, #tpu.memory_space<vmem>>, vector<1x128xf32>
    %c5 = arith.constant 5 : index
    %c0_19 = arith.constant 0 : index
    %40 = vector.load %arg9[%c5, %c0_19] : memref<19x128xf32, #tpu.memory_space<vmem>>, vector<1x128xf32>
    %cst_20 = arith.constant dense<0.000000e+00> : vector<16xf32>
    %41 = vector.multi_reduction <add>, %38, %cst_20 [1] : vector<16x128xf32> to vector<16xf32>
    %42 = vector.shape_cast %41 : vector<16xf32> to vector<16x1xf32>
    %cst_21 = arith.constant 1.562500e-02 : f32
    %43 = vector.broadcast %cst_21 : f32 to vector<16x1xf32>
    %44 = arith.mulf %42, %43 : vector<16x1xf32>
    %45 = arith.mulf %38, %38 : vector<16x128xf32>
    %cst_22 = arith.constant dense<0.000000e+00> : vector<16xf32>
    %46 = vector.multi_reduction <add>, %45, %cst_22 [1] : vector<16x128xf32> to vector<16xf32>
    %47 = vector.shape_cast %46 : vector<16xf32> to vector<16x1xf32>
    %cst_23 = arith.constant 1.562500e-02 : f32
    %48 = vector.broadcast %cst_23 : f32 to vector<16x1xf32>
    %49 = arith.mulf %47, %48 : vector<16x1xf32>
    %50 = arith.mulf %44, %44 : vector<16x1xf32>
    %51 = arith.subf %49, %50 : vector<16x1xf32>
    %52 = vector.broadcast %44 : vector<16x1xf32> to vector<16x128xf32>
    %53 = arith.subf %38, %52 : vector<16x128xf32>
    %cst_24 = arith.constant 9.99999974E-6 : f32
    %54 = vector.broadcast %cst_24 : f32 to vector<16x1xf32>
    %55 = arith.addf %51, %54 : vector<16x1xf32>
    %56 = math.rsqrt %55 : vector<16x1xf32>
    %57 = vector.broadcast %56 : vector<16x1xf32> to vector<16x128xf32>
    %58 = arith.mulf %53, %57 : vector<16x128xf32>
    %59 = vector.broadcast %39 : vector<1x128xf32> to vector<16x128xf32>
    %60 = arith.mulf %58, %59 : vector<16x128xf32>
    %61 = vector.broadcast %40 : vector<1x128xf32> to vector<16x128xf32>
    %62 = arith.addf %60, %61 : vector<16x128xf32>
    %cst_25 = arith.constant 0.000000e+00 : f32
    %63 = vector.broadcast %cst_25 : f32 to vector<16x128xf32>
    %64 = arith.cmpf oge, %62, %63 : vector<16x128xf32>
    %cst_26 = arith.constant 2.000000e-02 : f32
    %65 = vector.broadcast %cst_26 : f32 to vector<16x128xf32>
    %66 = arith.mulf %65, %62 : vector<16x128xf32>
    %67 = arith.select %64, %62, %66 : vector<16x128xi1>, vector<16x128xf32>
    %c0_27 = arith.constant 0 : index
    %c0_28 = arith.constant 0 : index
    %68 = vector.load %arg4[%c0_27, %c0_28] : memref<128x128xbf16, #tpu.memory_space<vmem>>, vector<128x128xbf16>
    %c6 = arith.constant 6 : index
    %c0_29 = arith.constant 0 : index
    %69 = vector.load %arg9[%c6, %c0_29] : memref<19x128xf32, #tpu.memory_space<vmem>>, vector<1x128xf32>
    %70 = arith.truncf %67 : vector<16x128xf32> to vector<16x128xbf16>
    %cst_30 = arith.constant dense<0.000000e+00> : vector<16x128xf32>
    %71 = tpu.matmul %70, %68, %cst_30 {dimension_numbers = #tpu.dot_dimension_numbers<[1], [0], [0], [1], [0, 0, 1, 1], [], []>} : vector<16x128xbf16>, vector<128x128xbf16>, vector<16x128xf32> -> vector<16x128xf32>
    %72 = vector.broadcast %69 : vector<1x128xf32> to vector<16x128xf32>
    %73 = arith.addf %71, %72 : vector<16x128xf32>
    %c7 = arith.constant 7 : index
    %c0_31 = arith.constant 0 : index
    %74 = vector.load %arg9[%c7, %c0_31] : memref<19x128xf32, #tpu.memory_space<vmem>>, vector<1x128xf32>
    %c8 = arith.constant 8 : index
    %c0_32 = arith.constant 0 : index
    %75 = vector.load %arg9[%c8, %c0_32] : memref<19x128xf32, #tpu.memory_space<vmem>>, vector<1x128xf32>
    %cst_33 = arith.constant dense<0.000000e+00> : vector<16xf32>
    %76 = vector.multi_reduction <add>, %73, %cst_33 [1] : vector<16x128xf32> to vector<16xf32>
    %77 = vector.shape_cast %76 : vector<16xf32> to vector<16x1xf32>
    %cst_34 = arith.constant 3.125000e-02 : f32
    %78 = vector.broadcast %cst_34 : f32 to vector<16x1xf32>
    %79 = arith.mulf %77, %78 : vector<16x1xf32>
    %80 = arith.mulf %73, %73 : vector<16x128xf32>
    %cst_35 = arith.constant dense<0.000000e+00> : vector<16xf32>
    %81 = vector.multi_reduction <add>, %80, %cst_35 [1] : vector<16x128xf32> to vector<16xf32>
    %82 = vector.shape_cast %81 : vector<16xf32> to vector<16x1xf32>
    %cst_36 = arith.constant 3.125000e-02 : f32
    %83 = vector.broadcast %cst_36 : f32 to vector<16x1xf32>
    %84 = arith.mulf %82, %83 : vector<16x1xf32>
    %85 = arith.mulf %79, %79 : vector<16x1xf32>
    %86 = arith.subf %84, %85 : vector<16x1xf32>
    %87 = vector.broadcast %79 : vector<16x1xf32> to vector<16x128xf32>
    %88 = arith.subf %73, %87 : vector<16x128xf32>
    %cst_37 = arith.constant 9.99999974E-6 : f32
    %89 = vector.broadcast %cst_37 : f32 to vector<16x1xf32>
    %90 = arith.addf %86, %89 : vector<16x1xf32>
    %91 = math.rsqrt %90 : vector<16x1xf32>
    %92 = vector.broadcast %91 : vector<16x1xf32> to vector<16x128xf32>
    %93 = arith.mulf %88, %92 : vector<16x128xf32>
    %94 = vector.broadcast %74 : vector<1x128xf32> to vector<16x128xf32>
    %95 = arith.mulf %93, %94 : vector<16x128xf32>
    %96 = vector.broadcast %75 : vector<1x128xf32> to vector<16x128xf32>
    %97 = arith.addf %95, %96 : vector<16x128xf32>
    %cst_38 = arith.constant 0.000000e+00 : f32
    %98 = vector.broadcast %cst_38 : f32 to vector<16x128xf32>
    %99 = arith.cmpf oge, %97, %98 : vector<16x128xf32>
    %cst_39 = arith.constant 2.000000e-02 : f32
    %100 = vector.broadcast %cst_39 : f32 to vector<16x128xf32>
    %101 = arith.mulf %100, %97 : vector<16x128xf32>
    %102 = arith.select %99, %97, %101 : vector<16x128xi1>, vector<16x128xf32>
    %c0_40 = arith.constant 0 : index
    %c0_41 = arith.constant 0 : index
    %103 = vector.load %arg5[%c0_40, %c0_41] : memref<128x128xbf16, #tpu.memory_space<vmem>>, vector<128x128xbf16>
    %c9 = arith.constant 9 : index
    %c0_42 = arith.constant 0 : index
    %104 = vector.load %arg9[%c9, %c0_42] : memref<19x128xf32, #tpu.memory_space<vmem>>, vector<1x128xf32>
    %105 = arith.truncf %102 : vector<16x128xf32> to vector<16x128xbf16>
    %cst_43 = arith.constant dense<0.000000e+00> : vector<16x128xf32>
    %106 = tpu.matmul %105, %103, %cst_43 {dimension_numbers = #tpu.dot_dimension_numbers<[1], [0], [0], [1], [0, 0, 1, 1], [], []>} : vector<16x128xbf16>, vector<128x128xbf16>, vector<16x128xf32> -> vector<16x128xf32>
    %107 = vector.broadcast %104 : vector<1x128xf32> to vector<16x128xf32>
    %108 = arith.addf %106, %107 : vector<16x128xf32>
    %c10 = arith.constant 10 : index
    %c0_44 = arith.constant 0 : index
    %109 = vector.load %arg9[%c10, %c0_44] : memref<19x128xf32, #tpu.memory_space<vmem>>, vector<1x128xf32>
    %c11 = arith.constant 11 : index
    %c0_45 = arith.constant 0 : index
    %110 = vector.load %arg9[%c11, %c0_45] : memref<19x128xf32, #tpu.memory_space<vmem>>, vector<1x128xf32>
    %cst_46 = arith.constant dense<0.000000e+00> : vector<16xf32>
    %111 = vector.multi_reduction <add>, %108, %cst_46 [1] : vector<16x128xf32> to vector<16xf32>
    %112 = vector.shape_cast %111 : vector<16xf32> to vector<16x1xf32>
    %cst_47 = arith.constant 3.125000e-02 : f32
    %113 = vector.broadcast %cst_47 : f32 to vector<16x1xf32>
    %114 = arith.mulf %112, %113 : vector<16x1xf32>
    %115 = arith.mulf %108, %108 : vector<16x128xf32>
    %cst_48 = arith.constant dense<0.000000e+00> : vector<16xf32>
    %116 = vector.multi_reduction <add>, %115, %cst_48 [1] : vector<16x128xf32> to vector<16xf32>
    %117 = vector.shape_cast %116 : vector<16xf32> to vector<16x1xf32>
    %cst_49 = arith.constant 3.125000e-02 : f32
    %118 = vector.broadcast %cst_49 : f32 to vector<16x1xf32>
    %119 = arith.mulf %117, %118 : vector<16x1xf32>
    %120 = arith.mulf %114, %114 : vector<16x1xf32>
    %121 = arith.subf %119, %120 : vector<16x1xf32>
    %122 = vector.broadcast %114 : vector<16x1xf32> to vector<16x128xf32>
    %123 = arith.subf %108, %122 : vector<16x128xf32>
    %cst_50 = arith.constant 9.99999974E-6 : f32
    %124 = vector.broadcast %cst_50 : f32 to vector<16x1xf32>
    %125 = arith.addf %121, %124 : vector<16x1xf32>
    %126 = math.rsqrt %125 : vector<16x1xf32>
    %127 = vector.broadcast %126 : vector<16x1xf32> to vector<16x128xf32>
    %128 = arith.mulf %123, %127 : vector<16x128xf32>
    %129 = vector.broadcast %109 : vector<1x128xf32> to vector<16x128xf32>
    %130 = arith.mulf %128, %129 : vector<16x128xf32>
    %131 = vector.broadcast %110 : vector<1x128xf32> to vector<16x128xf32>
    %132 = arith.addf %130, %131 : vector<16x128xf32>
    %cst_51 = arith.constant 0.000000e+00 : f32
    %133 = vector.broadcast %cst_51 : f32 to vector<16x128xf32>
    %134 = arith.cmpf oge, %132, %133 : vector<16x128xf32>
    %cst_52 = arith.constant 2.000000e-02 : f32
    %135 = vector.broadcast %cst_52 : f32 to vector<16x128xf32>
    %136 = arith.mulf %135, %132 : vector<16x128xf32>
    %137 = arith.select %134, %132, %136 : vector<16x128xi1>, vector<16x128xf32>
    %c0_53 = arith.constant 0 : index
    %c0_54 = arith.constant 0 : index
    %138 = vector.load %arg6[%c0_53, %c0_54] : memref<128x128xbf16, #tpu.memory_space<vmem>>, vector<128x128xbf16>
    %c12 = arith.constant 12 : index
    %c0_55 = arith.constant 0 : index
    %139 = vector.load %arg9[%c12, %c0_55] : memref<19x128xf32, #tpu.memory_space<vmem>>, vector<1x128xf32>
    %140 = arith.truncf %137 : vector<16x128xf32> to vector<16x128xbf16>
    %cst_56 = arith.constant dense<0.000000e+00> : vector<16x128xf32>
    %141 = tpu.matmul %140, %138, %cst_56 {dimension_numbers = #tpu.dot_dimension_numbers<[1], [0], [0], [1], [0, 0, 1, 1], [], []>} : vector<16x128xbf16>, vector<128x128xbf16>, vector<16x128xf32> -> vector<16x128xf32>
    %142 = vector.broadcast %139 : vector<1x128xf32> to vector<16x128xf32>
    %143 = arith.addf %141, %142 : vector<16x128xf32>
    %c13 = arith.constant 13 : index
    %c0_57 = arith.constant 0 : index
    %144 = vector.load %arg9[%c13, %c0_57] : memref<19x128xf32, #tpu.memory_space<vmem>>, vector<1x128xf32>
    %c14 = arith.constant 14 : index
    %c0_58 = arith.constant 0 : index
    %145 = vector.load %arg9[%c14, %c0_58] : memref<19x128xf32, #tpu.memory_space<vmem>>, vector<1x128xf32>
    %cst_59 = arith.constant dense<0.000000e+00> : vector<16xf32>
    %146 = vector.multi_reduction <add>, %143, %cst_59 [1] : vector<16x128xf32> to vector<16xf32>
    %147 = vector.shape_cast %146 : vector<16xf32> to vector<16x1xf32>
    %cst_60 = arith.constant 1.562500e-02 : f32
    %148 = vector.broadcast %cst_60 : f32 to vector<16x1xf32>
    %149 = arith.mulf %147, %148 : vector<16x1xf32>
    %150 = arith.mulf %143, %143 : vector<16x128xf32>
    %cst_61 = arith.constant dense<0.000000e+00> : vector<16xf32>
    %151 = vector.multi_reduction <add>, %150, %cst_61 [1] : vector<16x128xf32> to vector<16xf32>
    %152 = vector.shape_cast %151 : vector<16xf32> to vector<16x1xf32>
    %cst_62 = arith.constant 1.562500e-02 : f32
    %153 = vector.broadcast %cst_62 : f32 to vector<16x1xf32>
    %154 = arith.mulf %152, %153 : vector<16x1xf32>
    %155 = arith.mulf %149, %149 : vector<16x1xf32>
    %156 = arith.subf %154, %155 : vector<16x1xf32>
    %157 = vector.broadcast %149 : vector<16x1xf32> to vector<16x128xf32>
    %158 = arith.subf %143, %157 : vector<16x128xf32>
    %cst_63 = arith.constant 9.99999974E-6 : f32
    %159 = vector.broadcast %cst_63 : f32 to vector<16x1xf32>
    %160 = arith.addf %156, %159 : vector<16x1xf32>
    %161 = math.rsqrt %160 : vector<16x1xf32>
    %162 = vector.broadcast %161 : vector<16x1xf32> to vector<16x128xf32>
    %163 = arith.mulf %158, %162 : vector<16x128xf32>
    %164 = vector.broadcast %144 : vector<1x128xf32> to vector<16x128xf32>
    %165 = arith.mulf %163, %164 : vector<16x128xf32>
    %166 = vector.broadcast %145 : vector<1x128xf32> to vector<16x128xf32>
    %167 = arith.addf %165, %166 : vector<16x128xf32>
    %cst_64 = arith.constant 0.000000e+00 : f32
    %168 = vector.broadcast %cst_64 : f32 to vector<16x128xf32>
    %169 = arith.cmpf oge, %167, %168 : vector<16x128xf32>
    %cst_65 = arith.constant 2.000000e-02 : f32
    %170 = vector.broadcast %cst_65 : f32 to vector<16x128xf32>
    %171 = arith.mulf %170, %167 : vector<16x128xf32>
    %172 = arith.select %169, %167, %171 : vector<16x128xi1>, vector<16x128xf32>
    %c0_66 = arith.constant 0 : index
    %c0_67 = arith.constant 0 : index
    %173 = vector.load %arg7[%c0_66, %c0_67] : memref<128x128xbf16, #tpu.memory_space<vmem>>, vector<128x128xbf16>
    %c15 = arith.constant 15 : index
    %c0_68 = arith.constant 0 : index
    %174 = vector.load %arg9[%c15, %c0_68] : memref<19x128xf32, #tpu.memory_space<vmem>>, vector<1x128xf32>
    %175 = arith.truncf %172 : vector<16x128xf32> to vector<16x128xbf16>
    %cst_69 = arith.constant dense<0.000000e+00> : vector<16x128xf32>
    %176 = tpu.matmul %175, %173, %cst_69 {dimension_numbers = #tpu.dot_dimension_numbers<[1], [0], [0], [1], [0, 0, 1, 1], [], []>} : vector<16x128xbf16>, vector<128x128xbf16>, vector<16x128xf32> -> vector<16x128xf32>
    %177 = vector.broadcast %174 : vector<1x128xf32> to vector<16x128xf32>
    %178 = arith.addf %176, %177 : vector<16x128xf32>
    %c16 = arith.constant 16 : index
    %c0_70 = arith.constant 0 : index
    %179 = vector.load %arg9[%c16, %c0_70] : memref<19x128xf32, #tpu.memory_space<vmem>>, vector<1x128xf32>
    %c17 = arith.constant 17 : index
    %c0_71 = arith.constant 0 : index
    %180 = vector.load %arg9[%c17, %c0_71] : memref<19x128xf32, #tpu.memory_space<vmem>>, vector<1x128xf32>
    %cst_72 = arith.constant dense<0.000000e+00> : vector<16xf32>
    %181 = vector.multi_reduction <add>, %178, %cst_72 [1] : vector<16x128xf32> to vector<16xf32>
    %182 = vector.shape_cast %181 : vector<16xf32> to vector<16x1xf32>
    %cst_73 = arith.constant 1.280000e+02 : f32
    %183 = vector.broadcast %cst_73 : f32 to vector<16x1xf32>
    %184 = arith.divf %182, %183 : vector<16x1xf32>
    %185 = vector.broadcast %184 : vector<16x1xf32> to vector<16x128xf32>
    %186 = arith.subf %178, %185 : vector<16x128xf32>
    %187 = arith.mulf %186, %186 : vector<16x128xf32>
    %cst_74 = arith.constant dense<0.000000e+00> : vector<16xf32>
    %188 = vector.multi_reduction <add>, %187, %cst_74 [1] : vector<16x128xf32> to vector<16xf32>
    %189 = vector.shape_cast %188 : vector<16xf32> to vector<16x1xf32>
    %cst_75 = arith.constant 1.280000e+02 : f32
    %190 = vector.broadcast %cst_75 : f32 to vector<16x1xf32>
    %191 = arith.divf %189, %190 : vector<16x1xf32>
    %cst_76 = arith.constant 9.99999974E-6 : f32
    %192 = vector.broadcast %cst_76 : f32 to vector<16x1xf32>
    %193 = arith.addf %191, %192 : vector<16x1xf32>
    %194 = math.rsqrt %193 : vector<16x1xf32>
    %195 = vector.broadcast %194 : vector<16x1xf32> to vector<16x128xf32>
    %196 = arith.mulf %186, %195 : vector<16x128xf32>
    %197 = vector.broadcast %179 : vector<1x128xf32> to vector<16x128xf32>
    %198 = arith.mulf %196, %197 : vector<16x128xf32>
    %199 = vector.broadcast %180 : vector<1x128xf32> to vector<16x128xf32>
    %200 = arith.addf %198, %199 : vector<16x128xf32>
    %cst_77 = arith.constant 0.000000e+00 : f32
    %201 = vector.broadcast %cst_77 : f32 to vector<16x128xf32>
    %202 = arith.cmpf oge, %200, %201 : vector<16x128xf32>
    %cst_78 = arith.constant 2.000000e-02 : f32
    %203 = vector.broadcast %cst_78 : f32 to vector<16x128xf32>
    %204 = arith.mulf %203, %200 : vector<16x128xf32>
    %205 = arith.select %202, %200, %204 : vector<16x128xi1>, vector<16x128xf32>
    %c0_79 = arith.constant 0 : index
    %c0_80 = arith.constant 0 : index
    %206 = vector.load %arg8[%c0_79, %c0_80] : memref<128x32xbf16, #tpu.memory_space<vmem>>, vector<128x32xbf16>
    %c18 = arith.constant 18 : index
    %c0_81 = arith.constant 0 : index
    %207 = vector.load %arg9[%c18, %c0_81] : memref<19x128xf32, #tpu.memory_space<vmem>>, vector<1x32xf32>
    %208 = arith.truncf %205 : vector<16x128xf32> to vector<16x128xbf16>
    %cst_82 = arith.constant dense<0.000000e+00> : vector<16x32xf32>
    %209 = tpu.matmul %208, %206, %cst_82 {dimension_numbers = #tpu.dot_dimension_numbers<[1], [0], [0], [1], [0, 0, 1, 1], [], []>} : vector<16x128xbf16>, vector<128x32xbf16>, vector<16x32xf32> -> vector<16x32xf32>
    %210 = vector.broadcast %207 : vector<1x32xf32> to vector<16x32xf32>
    %211 = arith.addf %209, %210 : vector<16x32xf32>
    %cst_83 = arith.constant dense<0xFF800000> : vector<16xf32>
    %212 = vector.multi_reduction <maximumf>, %211, %cst_83 [1] : vector<16x32xf32> to vector<16xf32>
    %213 = vector.shape_cast %212 : vector<16xf32> to vector<16x1xf32>
    %214 = vector.broadcast %213 : vector<16x1xf32> to vector<16x32xf32>
    %215 = arith.subf %211, %214 : vector<16x32xf32>
    %216 = math.exp %215 : vector<16x32xf32>
    %cst_84 = arith.constant dense<0.000000e+00> : vector<16xf32>
    %217 = vector.multi_reduction <add>, %216, %cst_84 [1] : vector<16x32xf32> to vector<16xf32>
    %218 = vector.shape_cast %217 : vector<16xf32> to vector<16x1xf32>
    %219 = vector.broadcast %218 : vector<16x1xf32> to vector<16x32xf32>
    %220 = arith.divf %216, %219 : vector<16x32xf32>
    %c0_85 = arith.constant 0 : index
    %c0_86 = arith.constant 0 : index
    %221 = vector.load %arg10[%c0_85, %c0_86] : memref<16x32xf32, #tpu.memory_space<vmem>>, vector<16x32xf32>
    tpu.vector_store %arg10[%c0_85, %c0_86], %220 {strides = array<i32>} : memref<16x32xf32, #tpu.memory_space<vmem>>, vector<16x32xf32>,
    return
  }
  func.func @transform_0(%arg0: i32) -> (i32, i32) {
    %c0_i32 = arith.constant 0 : i32
    %c0_i32_0 = arith.constant 0 : i32
    return %arg0, %c0_i32 : i32, i32
  }
  func.func @transform_1(%arg0: i32) -> (i32, i32) {
    %c0_i32 = arith.constant 0 : i32
    %c0_i32_0 = arith.constant 0 : i32
    %c0_i32_1 = arith.constant 0 : i32
    return %c0_i32, %c0_i32_0 : i32, i32
  }
  func.func @transform_2(%arg0: i32) -> (i32, i32) {
    %c0_i32 = arith.constant 0 : i32
    %c0_i32_0 = arith.constant 0 : i32
    %c0_i32_1 = arith.constant 0 : i32
    return %c0_i32, %c0_i32_0 : i32, i32
  }
  func.func @transform_3(%arg0: i32) -> (i32, i32) {
    %c0_i32 = arith.constant 0 : i32
    %c0_i32_0 = arith.constant 0 : i32
    %c0_i32_1 = arith.constant 0 : i32
    return %c0_i32, %c0_i32_0 : i32, i32
  }
  func.func @transform_4(%arg0: i32) -> (i32, i32) {
    %c0_i32 = arith.constant 0 : i32
    %c0_i32_0 = arith.constant 0 : i32
    %c0_i32_1 = arith.constant 0 : i32
    return %c0_i32, %c0_i32_0 : i32, i32
  }
  func.func @transform_5(%arg0: i32) -> (i32, i32) {
    %c0_i32 = arith.constant 0 : i32
    %c0_i32_0 = arith.constant 0 : i32
    %c0_i32_1 = arith.constant 0 : i32
    return %c0_i32, %c0_i32_0 : i32, i32
  }
  func.func @transform_6(%arg0: i32) -> (i32, i32) {
    %c0_i32 = arith.constant 0 : i32
    %c0_i32_0 = arith.constant 0 : i32
    %c0_i32_1 = arith.constant 0 : i32
    return %c0_i32, %c0_i32_0 : i32, i32
  }
  func.func @transform_7(%arg0: i32) -> (i32, i32) {
    %c0_i32 = arith.constant 0 : i32
    %c0_i32_0 = arith.constant 0 : i32
    %c0_i32_1 = arith.constant 0 : i32
    return %c0_i32, %c0_i32_0 : i32, i32
  }
  func.func @transform_8(%arg0: i32) -> (i32, i32) {
    %c0_i32 = arith.constant 0 : i32
    %c0_i32_0 = arith.constant 0 : i32
    %c0_i32_1 = arith.constant 0 : i32
    return %c0_i32, %c0_i32_0 : i32, i32
  }
  func.func @transform_9(%arg0: i32) -> (i32, i32) {
    %c0_i32 = arith.constant 0 : i32
    %c0_i32_0 = arith.constant 0 : i32
    return %arg0, %c0_i32 : i32, i32
  }
}

</mosaic_0001>

<bundles_post_ra>
// kernel: autoencoder_forward.1
= control target key start
LH: loop header
LB: loop body
LE: loop exit
PB: predicated region body
PF: predicated region fallthrough
CT: control target
= control target key end

     0   :  { %14 = vsyncpa [#allocation3], 0  ;;  %s2414_s0 = inlined_call_operand.vmem [shape: bf16[64,32], index: 0, kind: input, shape index: {}]   ;;  %s2415_s1 = inlined_call_operand.hbm [shape: bf16[32,128], index: 1, kind: input, shape index: {}]   ;;  %s2416_s2 = inlined_call_operand.vmem [shape: bf16[128,128], index: 2, kind: input, shape index: {}]   ;;  %s2417_s3 = inlined_call_operand.vmem [shape: bf16[128,128], index: 3, kind: input, shape index: {}]   ;;  %s2418_s4 = inlined_call_operand.vmem [shape: bf16[128,128], index: 4, kind: input, shape index: {}]   ;;  %s2419_s5 = inlined_call_operand.hbm [shape: bf16[128,128], index: 5, kind: input, shape index: {}]   ;;  %s2420_s6 = inlined_call_operand.hbm [shape: bf16[128,128], index: 6, kind: input, shape index: {}]   ;;  %s2421_s7 = inlined_call_operand.vmem [shape: bf16[128,32], index: 7, kind: input, shape index: {}]   ;;  %s2422_s8 = inlined_call_operand.vmem [shape: f32[19,128], index: 8, kind: input, shape index: {}]   ;;  %s2423_s9 = inlined_call_operand.vmem [shape: f32[64,32], index: 9, kind: output, shape index: {}]  }
   0x1   :  { %15 = vsyncpa [#allocation5], 0  ;;  %s2056_s30 = smov 0  }
   0x2 LB: > { %s1500_s10 = sadd.s32 4294967295, %s1997_s30   ;;  %p1502_p0 = scmp.ge.s32.totalorder %s1997_s30, 1  ;;  %s1997_s30 = sphi %s2056_s30, %s21_s30  }
   0x3   : > { %p246_p1 = scmp.lt.s32.totalorder %s1997_s30, 5  ;;  %p2066_p2 = scmp.eq.s32.totalorder %s1500_s10, 0 }
   0x4   : > { %s1999_s13 = smov [#allocation4]   ;;  %s2000_s15 = smov [#allocation2]  }
   0x5   : > { %s2427_s11 = scalar_select %p2066_p2, 1, 0 }
   0x6   : > { %p2070_p3 = pnand %p1502_p0, %p246_p1  ;;  %s280_s14 = sshll.u32 %s1999_s13, 4  ;;  %s281_s14 = int_to_ptr.vmem [resolvable:$true] %s280_s14 }
   0x7   : > { %s258_s16 = sshll.u32 %s2000_s15, 4  ;;  %s2001_s18 = smov [#allocation6]   ;;  %s2082_s16 = int_to_ptr.vmem [resolvable:$true] %s258_s16 }
   0x8   : > { %s2428_s12 = scalar_select %p2070_p3, 1, 0 }
   0x9   : > { %p1785_p4 = pneg %p2070_p3  ;;  %s293_s19 = sshll.u32 %s2001_s18, 4  ;;  %s2084_s19 = int_to_ptr.vmem [resolvable:$true] %s293_s19 }
   0xa   : > { %s1899_s22 = scalar_lea.hbm %s2419_s5, 1024 }
   0xb   : > { %p2078_p5 = pnand %p2066_p2, %p1785_p4  ;;  %p1900_p6 = scmp.ne.s32.totalorder %s2419_s5, %s1899_s22 }
   0xc   : > { %p1906_p10 = scmp.lt.u32.totalorder %s1899_s22, %s2419_s5 }
   0xd   : > { %p2094_p7 = pneg %p2078_p5 }
   0xf   : > { %p1902_p8 = pnand %p2094_p7, %p1900_p6 }
  0x11   : > { %p1903_p9 = pneg %p1902_p8 }
  0x13   : > { %p1908_p11 = pnand %p1906_p10, %p1903_p9 }
  0x15   : > { %1911 = shalt.err (!%p1908_p11)
}
  0x16   : > { %s1912_s28 = scalar_lea.vmem %s281_s14, 1024  ;;  %p1920_p1 = scmp.lt.s32.totalorder %s281_s14, %s281_s14 }
  0x17   : > { %p1913_p12 = scmp.ne.s32.totalorder %s281_s14, %s1912_s28  ;;  %p1921_p4 = scmp.lt.s32.totalorder %s1912_s28, %s1912_s28 }
  0x19   : > { %p1915_p13 = pnand %p1913_p12, %p2094_p7  ;;  %p1922_p2 = por %p1921_p4, %p1920_p1 }
  0x1b   : > { %p1916_p0 = pneg %p1915_p13 }
  0x1d   : > { %p1923_p3 = pnand %p1922_p2, %p1916_p0 }
  0x1f   : > { %1926 = shalt.err (!%p1923_p3)
}
  0x20   : > { %s2002_s29 = smov 64   ;;  %s2003_s13 = smov 4  }
  0x21   : > { %1791 = dma.hbm_to_vmem [thread:$0]  (!%p2078_p5), %s2419_s5, 1024, %s281_s14, [#allocation5], %s2002_s29, %s2002_s29, %s2003_s13  }
  0x22   : > { %s1927_s22 = scalar_lea.hbm %s2415_s1, 256 }
  0x23   : > { %p1928_p2 = scmp.ne.s32.totalorder %s2415_s1, %s1927_s22  ;;  %p1934_p8 = scmp.lt.u32.totalorder %s1927_s22, %s2415_s1 }
  0x25   : > { %p1930_p3 = pnand %p1928_p2, %p2094_p7 }
  0x27   : > { %p1931_p6 = pneg %p1930_p3 }
  0x29   : > { %p1936_p9 = pnand %p1934_p8, %p1931_p6 }
  0x2b   : > { %1939 = shalt.err (!%p1936_p9)
}
  0x2c   : > { %s1940_s14 = scalar_lea.vmem %s2082_s16, 256  ;;  %p1948_p13 = scmp.lt.s32.totalorder %s2082_s16, %s2082_s16 }
  0x2d   : > { %p1941_p10 = scmp.ne.s32.totalorder %s2082_s16, %s1940_s14  ;;  %p1949_p0 = scmp.lt.s32.totalorder %s1940_s14, %s1940_s14 }
  0x2f   : > { %p1943_p11 = pnand %p1941_p10, %p2094_p7  ;;  %p1950_p1 = por %p1949_p0, %p1948_p13 }
  0x31   : > { %p1944_p12 = pneg %p1943_p11 }
  0x33   : > { %p1951_p4 = pnand %p1950_p1, %p1944_p12 }
  0x35   : > { %1954 = shalt.err (!%p1951_p4)
}
  0x36   : > { %1788 = dma.hbm_to_vmem [thread:$0]  (!%p2078_p5), %s2415_s1, 256, %s2082_s16, [#allocation3], %s2002_s29, %s2002_s29, %s2003_s13  }
  0x37   : > { %s1955_s21 = scalar_lea.hbm %s2420_s6, 1024 }
  0x38   : > { %p1956_p2 = scmp.ne.s32.totalorder %s2420_s6, %s1955_s21  ;;  %p1962_p8 = scmp.lt.u32.totalorder %s1955_s21, %s2420_s6 }
  0x3a   : > { %p1958_p3 = pnand %p1956_p2, %p2094_p7 }
  0x3c   : > { %p1959_p6 = pneg %p1958_p3 }
  0x3e   : > { %p1964_p9 = pnand %p1962_p8, %p1959_p6 }
  0x40   : > { %1967 = shalt.err (!%p1964_p9)
}
  0x41   : > { %s1968_s16 = scalar_lea.vmem %s2084_s19, 1024  ;;  %p1976_p13 = scmp.lt.s32.totalorder %s2084_s19, %s2084_s19 }
  0x42   : > { %p1969_p10 = scmp.ne.s32.totalorder %s2084_s19, %s1968_s16  ;;  %p1977_p0 = scmp.lt.s32.totalorder %s1968_s16, %s1968_s16 }
  0x44   : > { %p1971_p11 = pnand %p1969_p10, %p2094_p7  ;;  %p1978_p1 = por %p1977_p0, %p1976_p13 }
  0x46   : > { %p1972_p12 = pneg %p1971_p11 }
  0x48   : > { %p1979_p4 = pnand %p1978_p1, %p1972_p12 }
  0x4a   : > { %1982 = shalt.err (!%p1979_p4)
}
  0x4b   : > { %1794 = dma.hbm_to_vmem [thread:$0]  (!%p2078_p5), %s2420_s6, 1024, %s2084_s19, [#allocation5], %s2002_s29, %s2002_s29, %s2003_s13  }
  0x4c   : > { %p2431_p2 = scmp.ne.s32.totalorder %s2428_s12, 0 }
  0x4d   : > { %p2432_p7 = scmp.ne.s32.totalorder (!%p2431_p2), %s2427_s11, 0 }
  0x4e   : > { %324 = sbr.rel (%p2431_p2) target bundleno = 3255 (0xcb7), region = 56 }
  0x55   : > { %1988 = dma.done.wait (%p2432_p7), [#allocation3], 256  }
  0x56   : > { %1990 = vsyncadd (%p2432_p7), [#allocation3], 4294967040 }
  0x57   : > { %1992 = dma.done.wait (%p2432_p7), [#allocation5], 2048  }
  0x58   : > { %1994 = vsyncadd (%p2432_p7), [#allocation5], 4294965248  ;;  %s1511_s17 = sshll.u32 %s1500_s10, 1  ;;  %v2004_v0 = vmov 0.0   ;;  %vm2005_vm0 = vmmov 0   ;;  %v1816_v1 = vld [vmem:[#allocation2] sm:$0xff]  }
  0x59   : > { %1645 = vmatprep.subr.bf16.mxu0 %v2004_v0  ;;  %1649 = vmatprep.mubr.msk.bf16.mxu0 %vm2005_vm0, %v2004_v0  ;;  %p369_p5 = scmp.lt.s32.totalorder %s1511_s17, 7  ;;  %v1817_v2 = vld [vmem:[#allocation2 + $0x8] sm:$0xff]   ;;  %vm409_vm1 = vcmask 261120   ;;  %v1515_v4 = vld [vmem:[%s2422_s8] ss:$0 sm:$0xff]  ;;  %v1821_v21 = vld [vmem:[%s2416_s2 + $0x10] sm:$0xff]  }
  0x5a   : > { %1653 = vmatprep.subr.bf16.mxu1 %v2004_v0  ;;  %1669 = vmatprep.mubr.msk.bf16.mxu1 %vm2005_vm0, %v2004_v0  ;;  %v1819_v11 = vld [vmem:[%s2416_s2] sm:$0xff]   ;;  %v1820_v20 = vld [vmem:[%s2416_s2 + $0x8] sm:$0xff]   ;;  %v1822_v22 = vld [vmem:[%s2416_s2 + $0x18] sm:$0xff]  }
  0x5b   : > { %s2434_s17 = smov (!%p369_p5, %s1511_s17), 7  ;;  %1646 = vmatpush3.bf16.msra.mxu0 %v1816_v1  ;;  %1654 = vmatpush3.bf16.msra.mxu1 %v1819_v11  ;;  %v1823_v23 = vld [vmem:[%s2416_s2 + $0x20] sm:$0xff]   ;;  %v1824_v24 = vld [vmem:[%s2416_s2 + $0x28] sm:$0xff]   ;;  %v1825_v25 = vld [vmem:[%s2416_s2 + $0x30] sm:$0xff]  }
  0x5c   : > { %s1512_s11 = sshll.u32 %s2434_s17, 2  ;;  %1647 = vmatprep.subr.bf16.mxu0 %v2004_v0  ;;  %1655 = vmatprep.subr.bf16.mxu1 %v2004_v0  ;;  %v1826_v26 = vld [vmem:[%s2416_s2 + $0x38] sm:$0xff]   ;;  %v1520_v34 = vld [vmem:[%s2422_s8 + $0x1] ss:$0 sm:$0xff]  ;;  %v1521_v36 = vld [vmem:[%s2422_s8 + $0x2] ss:$0 sm:$0xff] }
  0x5d   : > { %s372_s19 = scalar_lea.vmem %s2414_s0, %s1512_s11  ;;  %v1522_v48 = vld [vmem:[%s2422_s8 + $0x3] ss:$0 sm:$0xff]  ;;  %v1828_v58 = vld [vmem:[%s2417_s3 + $0x8] sm:$0xff]   ;;  %v1829_v59 = vld [vmem:[%s2417_s3 + $0x10] sm:$0xff]   ;;  %s1514_s21 = sshll.u32 %s2434_s17, 3 }
  0x5e   : > { %v1818_v3 = vld [vmem:[%s372_s19] sm:$0xff]   ;;  %v1830_v60 = vld [vmem:[%s2417_s3 + $0x18] sm:$0xff]   ;;  %v1832_v62 = vld [vmem:[%s2417_s3 + $0x28] sm:$0xff]   ;;  %s378_s24 = scalar_lea.vmem %s2423_s9, %s1514_s21 }
  0x5f   : > { %1648 = vmatpush3.bf16.msra.mxu0 %v1817_v2  ;;  %1656 = vmatpush3.bf16.msra.mxu1 %v1820_v20  ;;  %v1827_v57 = vld [vmem:[%s2417_s3] sm:$0xff]   ;;  %v1833_v63 = vld [vmem:[%s2417_s3 + $0x30] sm:$0xff]   ;;  %v1834_v1 = vld [vmem:[%s2417_s3 + $0x38] sm:$0xff]  }
  0x60   : > { %1673 = vmatprep.subr.bf16.mxu0 %v2004_v0  ;;  %1657 = vmatprep.subr.bf16.mxu1 %v2004_v0  ;;  %v1831_v61 = vld [vmem:[%s2417_s3 + $0x20] sm:$0xff]  }
  0x62   : > { %1650 = vmatmul.mubr.msk.bf16.vlgmr.msra.gmra.mrb[0].mxu0 %vm409_vm1, %v1818_v3 }
  0x63   : > { %1689 = vmatprep.mubr.msk.bf16.mxu0 %vm2005_vm0, %v2004_v0  ;;  %1658 = vmatpush3.bf16.msra.mxu1 %v1821_v21 }
  0x64   : > { %1659 = vmatprep.subr.bf16.mxu1 %v2004_v0  ;;  %1674 = vmatpush3.bf16.msra.mxu0 %v1827_v57 }
  0x65   : > { %1675 = vmatprep.subr.bf16.mxu0 %v2004_v0 }
  0x67   : > { %1660 = vmatpush3.bf16.msra.mxu1 %v1822_v22  ;;  %v1532_v22 = vld [vmem:[%s2422_s8 + $0x5] ss:$0 sm:$0xff] }
  0x68   : > { %1661 = vmatprep.subr.bf16.mxu1 %v2004_v0  ;;  %1676 = vmatpush3.bf16.msra.mxu0 %v1828_v58 }
  0x69   : > { %1677 = vmatprep.subr.bf16.mxu0 %v2004_v0 }
  0x6b   : > { %1662 = vmatpush3.bf16.msra.mxu1 %v1823_v23 }
  0x6c   : > { %1663 = vmatprep.subr.bf16.mxu1 %v2004_v0  ;;  %1678 = vmatpush3.bf16.msra.mxu0 %v1829_v59 }
  0x6d   : > { %1679 = vmatprep.subr.bf16.mxu0 %v2004_v0 }
  0x6f   : > { %1664 = vmatpush3.bf16.msra.mxu1 %v1824_v24 }
  0x70   : > { %1665 = vmatprep.subr.bf16.mxu1 %v2004_v0  ;;  %1680 = vmatpush3.bf16.msra.mxu0 %v1830_v60 }
  0x71   : > { %1681 = vmatprep.subr.bf16.mxu0 %v2004_v0 }
  0x73   : > { %1666 = vmatpush3.bf16.msra.mxu1 %v1825_v25 }
  0x74   : > { %1667 = vmatprep.subr.bf16.mxu1 %v2004_v0  ;;  %1682 = vmatpush3.bf16.msra.mxu0 %v1831_v61 }
  0x75   : > { %1683 = vmatprep.subr.bf16.mxu0 %v2004_v0 }
  0x77   : > { %1668 = vmatpush3.bf16.msra.mxu1 %v1826_v26 }
  0x78   : > { %1693 = vmatprep.subr.bf16.mxu1 %v2004_v0  ;;  %1684 = vmatpush3.bf16.msra.mxu0 %v1832_v62 }
  0x79   : > { %1685 = vmatprep.subr.bf16.mxu0 %v2004_v0 }
  0x7c   : > { %1686 = vmatpush3.bf16.msra.mxu0 %v1833_v63 }
  0x7d   : > { %1687 = vmatprep.subr.bf16.mxu0 %v2004_v0 }
  0x80   : > { %1688 = vmatpush3.bf16.msra.mxu0 %v1834_v1 }
  0x81   : > { %1713 = vmatprep.subr.bf16.mxu0 %v2004_v0 }
 0x135   : > { %v447_v5 = vpop.f32.mrb[0].mxu0 }
 0x136   : > { %v448_v6 = vadd.f32 %v1515_v4, %v447_v5  ;;  %v1651_v7 = vpop.f32.mrb[1].mxu0 }
 0x137   : > { %v450_v8 = vpop.f32.mrb[2].mxu0 }
 0x138   : > { %456 = vadd.xlane.f32.xlu0 %v448_v6  ;;  %v1652_v9 = vpop.f32.mrb[3].mxu0  ;;  %v451_v10 = vadd.f32 %v1515_v4, %v450_v8 }
 0x13c   : > { %458 = vadd.xlane.f32.xlu0 %v451_v10 }
 0x1c5   : > { %v457_v12 = vpop.xlane.xlu0 %456 }
 0x1c6   : > { %v461_v13 = vmul.f32 0.0078125, %v457_v12 }
 0x1c8   : > { %v463_v14 = vsub.f32 %v448_v6, %v461_v13 }
 0x1c9   : > { %v459_v15 = vpop.xlane.xlu0 %458 }
 0x1ca   : > { %v462_v16 = vmul.f32 0.0078125, %v459_v15  ;;  %v465_v17 = vmul.f32 %v463_v14, %v463_v14 }
 0x1cc   : > { %v464_v18 = vsub.f32 %v451_v10, %v462_v16  ;;  %467 = vadd.xlane.f32.xlu1 %v465_v17 }
 0x1ce   : > { %v466_v19 = vmul.f32 %v464_v18, %v464_v18 }
 0x1d0   : > { %469 = vadd.xlane.f32.xlu1 %v466_v19 }
 0x259   : > { %v468_v27 = vpop.xlane.xlu1 %467 }
 0x25a   : > { %v471_v28 = vmul.f32 0.0078125, %v468_v27 }
 0x25c   : > { %v473_v29 = vadd.f32 1e-05, %v471_v28 }
 0x25d   : > { %v470_v30 = vpop.xlane.xlu1 %469 }
 0x25e   : > { %1867 = vrsqrt.f32 %v473_v29  ;;  %v472_v31 = vmul.f32 0.0078125, %v470_v30 }
 0x260   : > { %v474_v32 = vadd.f32 1e-05, %v472_v31 }
 0x262   : > { %1869 = vrsqrt.f32 %v474_v32 }
 0x268   : > { %v1868_v33 = vpop.eup %1867 }
 0x269   : > { %v477_v35 = vmul.f32 %v1868_v33, %v463_v14  ;;  %v1533_v33 = vld [vmem:[%s2422_s8 + $0x6] ss:$0 sm:$0xff] }
 0x26b   : > { %v483_v37 = vmul.f32 %v1520_v34, %v477_v35 }
 0x26c   : > { %v1870_v38 = vpop.eup %1869 }
 0x26d   : > { %v478_v39 = vmul.f32 %v1870_v38, %v464_v18  ;;  %v489_v40 = vadd.f32 %v1521_v36, %v483_v37  ;;  %v1531_v18 = vld [vmem:[%s2422_s8 + $0x4] ss:$0 sm:$0xff] }
 0x26f   : > { %v484_v41 = vmul.f32 %v1520_v34, %v478_v39  ;;  %v493_v43 = vmul.f32 0.02, %v489_v40  ;;  %vm491_vm2 = vcmp.ge.f32.partialorder %v489_v40, 0.0 }
 0x271   : > { %v490_v42 = vadd.f32 %v1521_v36, %v484_v41  ;;  %v495_v45 = vsel %vm491_vm2, %v489_v40, %v493_v43  ;;  %v1836_v43 = vld [vmem:[%s2418_s4 + $0x8] sm:$0xff]  }
 0x273   : > { %vm492_vm3 = vcmp.ge.f32.partialorder %v490_v42, 0.0  ;;  %v494_v44 = vmul.f32 0.02, %v490_v42 }
 0x275   : > { %v496_v46 = vsel %vm492_vm3, %v490_v42, %v494_v44  ;;  %v1835_v42 = vld [vmem:[%s2418_s4] sm:$0xff]   ;;  %v1837_v44 = vld [vmem:[%s2418_s4 + $0x10] sm:$0xff]  }
 0x276   : > { %v514_v47 = vpack.c.bf16 %v496_v46, %v495_v45  ;;  %v1838_v45 = vld [vmem:[%s2418_s4 + $0x18] sm:$0xff]   ;;  %v1839_v46 = vld [vmem:[%s2418_s4 + $0x20] sm:$0xff]  }
 0x278   : > { %1670 = vmatmul.mubr.bf16.vlgmr.msra.gmra.mrb[0].mxu1 %v514_v47  ;;  %v1840_v47 = vld [vmem:[%s2418_s4 + $0x28] sm:$0xff]  }
 0x279   : > { %1709 = vmatprep.mubr.msk.bf16.mxu1 %vm2005_vm0, %v2004_v0  ;;  %1694 = vmatpush3.bf16.msra.mxu1 %v1835_v42 }
 0x27a   : > { %1695 = vmatprep.subr.bf16.mxu1 %v2004_v0 }
 0x27d   : > { %1696 = vmatpush3.bf16.msra.mxu1 %v1836_v43 }
 0x27e   : > { %1697 = vmatprep.subr.bf16.mxu1 %v2004_v0 }
 0x281   : > { %1698 = vmatpush3.bf16.msra.mxu1 %v1837_v44 }
 0x282   : > { %1699 = vmatprep.subr.bf16.mxu1 %v2004_v0 }
 0x285   : > { %1700 = vmatpush3.bf16.msra.mxu1 %v1838_v45 }
 0x286   : > { %1701 = vmatprep.subr.bf16.mxu1 %v2004_v0 }
 0x289   : > { %1702 = vmatpush3.bf16.msra.mxu1 %v1839_v46 }
 0x28a   : > { %1703 = vmatprep.subr.bf16.mxu1 %v2004_v0 }
 0x28d   : > { %1704 = vmatpush3.bf16.msra.mxu1 %v1840_v47 }
 0x28e   : > { %1705 = vmatprep.subr.bf16.mxu1 %v2004_v0 }
 0x34b   : > { %v601_v49 = vpop.f32.mrb[0].mxu1 }
 0x34c   : > { %v602_v50 = vadd.f32 %v1522_v48, %v601_v49  ;;  %v1671_v51 = vpop.f32.mrb[1].mxu1  ;;  %v1842_v49 = vld [vmem:[%s2418_s4 + $0x38] sm:$0xff]  }
 0x34d   : > { %v604_v52 = vpop.f32.mrb[2].mxu1 }
 0x34e   : > { %v605_v53 = vadd.f32 %v1522_v48, %v604_v52  ;;  %610 = vadd.xlane.f32.xlu0 %v602_v50  ;;  %v1672_v54 = vpop.f32.mrb[3].mxu1  ;;  %v616_v55 = vmul.f32 %v602_v50, %v602_v50  ;;  %v1841_v48 = vld [vmem:[%s2418_s4 + $0x30] sm:$0xff]  }
 0x34f   : > { %1706 = vmatpush3.bf16.msra.mxu1 %v1841_v48 }
 0x350   : > { %612 = vadd.xlane.f32.xlu1 %v605_v53  ;;  %v617_v56 = vmul.f32 %v605_v53, %v605_v53  ;;  %1707 = vmatprep.subr.bf16.mxu1 %v2004_v0 }
 0x352   : > { %618 = vadd.xlane.f32.xlu0 %v616_v55 }
 0x353   : > { %1708 = vmatpush3.bf16.msra.mxu1 %v1842_v49 }
 0x354   : > { %620 = vadd.xlane.f32.xlu1 %v617_v56  ;;  %1733 = vmatprep.subr.bf16.mxu1 %v2004_v0 }
 0x3db   : > { %v611_v2 = vpop.xlane.xlu0 %610 }
 0x3dc   : > { %v614_v3 = vmul.f32 0.015625, %v611_v2 }
 0x3dd   : > { %v613_v4 = vpop.xlane.xlu1 %612 }
 0x3de   : > { %v615_v5 = vmul.f32 0.015625, %v613_v4  ;;  %v624_v7 = vmul.f32 %v614_v3, %v614_v3  ;;  %v628_v16 = vsub.f32 %v602_v50, %v614_v3  ;;  %v1542_v3 = vld [vmem:[%s2422_s8 + $0x7] ss:$0 sm:$0xff] }
 0x3df   : > { %v619_v6 = vpop.xlane.xlu0 %618 }
 0x3e0   : > { %v622_v8 = vmul.f32 0.015625, %v619_v6  ;;  %v625_v10 = vmul.f32 %v615_v5, %v615_v5  ;;  %v629_v19 = vsub.f32 %v605_v53, %v615_v5 }
 0x3e1   : > { %v621_v9 = vpop.xlane.xlu1 %620 }
 0x3e2   : > { %v626_v11 = vsub.f32 %v622_v8, %v624_v7  ;;  %v623_v12 = vmul.f32 0.015625, %v621_v9  ;;  %v1543_v7 = vld [vmem:[%s2422_s8 + $0x8] ss:$0 sm:$0xff] }
 0x3e4   : > { %v630_v13 = vadd.f32 1e-05, %v626_v11  ;;  %v627_v14 = vsub.f32 %v623_v12, %v625_v10 }
 0x3e6   : > { %1871 = vrsqrt.f32 %v630_v13  ;;  %v631_v15 = vadd.f32 1e-05, %v627_v14 }
 0x3e8   : > { %1873 = vrsqrt.f32 %v631_v15 }
 0x3f0   : > { %v1872_v17 = vpop.eup %1871 }
 0x3f1   : > { %v634_v20 = vmul.f32 %v1872_v17, %v628_v16 }
 0x3f2   : > { %v1874_v21 = vpop.eup %1873 }
 0x3f3   : > { %v635_v23 = vmul.f32 %v1874_v21, %v629_v19  ;;  %v640_v24 = vmul.f32 %v1531_v18, %v634_v20 }
 0x3f5   : > { %v641_v25 = vmul.f32 %v1531_v18, %v635_v23  ;;  %v646_v26 = vadd.f32 %v1532_v22, %v640_v24  ;;  %v1544_v18 = vld [vmem:[%s2422_s8 + $0x9] ss:$0 sm:$0xff] }
 0x3f7   : > { %v647_v27 = vadd.f32 %v1532_v22, %v641_v25  ;;  %v650_v28 = vmul.f32 0.02, %v646_v26  ;;  %vm648_vm4 = vcmp.ge.f32.partialorder %v646_v26, 0.0 }
 0x3f9   : > { %vm649_vm5 = vcmp.ge.f32.partialorder %v647_v27, 0.0  ;;  %v651_v29 = vmul.f32 0.02, %v647_v27  ;;  %v652_v30 = vsel %vm648_vm4, %v646_v26, %v650_v28  ;;  %v1844_v28 = vld [vmem:[#allocation4 + $0x8] sm:$0xff]  }
 0x3fb   : > { %v653_v31 = vsel %vm649_vm5, %v647_v27, %v651_v29  ;;  %v1843_v27 = vld [vmem:[#allocation4] sm:$0xff]   ;;  %v1845_v29 = vld [vmem:[#allocation4 + $0x10] sm:$0xff]  }
 0x3fc   : > { %v671_v32 = vpack.c.bf16 %v653_v31, %v652_v30  ;;  %v1846_v30 = vld [vmem:[#allocation4 + $0x18] sm:$0xff]   ;;  %v1847_v31 = vld [vmem:[#allocation4 + $0x20] sm:$0xff]  }
 0x3fe   : > { %1690 = vmatmul.mubr.bf16.vlgmr.msra.gmra.mrb[4].mxu0 %v671_v32  ;;  %v1848_v32 = vld [vmem:[#allocation4 + $0x28] sm:$0xff]  }
 0x3ff   : > { %1729 = vmatprep.mubr.msk.bf16.mxu0 %vm2005_vm0, %v2004_v0  ;;  %1714 = vmatpush3.bf16.msra.mxu0 %v1843_v27 }
 0x400   : > { %1715 = vmatprep.subr.bf16.mxu0 %v2004_v0 }
 0x403   : > { %1716 = vmatpush3.bf16.msra.mxu0 %v1844_v28 }
 0x404   : > { %1717 = vmatprep.subr.bf16.mxu0 %v2004_v0 }
 0x407   : > { %1718 = vmatpush3.bf16.msra.mxu0 %v1845_v29 }
 0x408   : > { %1719 = vmatprep.subr.bf16.mxu0 %v2004_v0 }
 0x40b   : > { %1720 = vmatpush3.bf16.msra.mxu0 %v1846_v30 }
 0x40c   : > { %1721 = vmatprep.subr.bf16.mxu0 %v2004_v0 }
 0x40f   : > { %1722 = vmatpush3.bf16.msra.mxu0 %v1847_v31 }
 0x410   : > { %1723 = vmatprep.subr.bf16.mxu0 %v2004_v0 }
 0x413   : > { %1724 = vmatpush3.bf16.msra.mxu0 %v1848_v32 }
 0x414   : > { %1725 = vmatprep.subr.bf16.mxu0 %v2004_v0 }
 0x4d1   : > { %v758_v34 = vpop.f32.mrb[4].mxu0 }
 0x4d2   : > { %v759_v35 = vadd.f32 %v1533_v33, %v758_v34  ;;  %v1691_v36 = vpop.f32.mrb[5].mxu0  ;;  %v1850_v34 = vld [vmem:[#allocation4 + $0x38] sm:$0xff]  }
 0x4d3   : > { %v761_v37 = vpop.f32.mrb[6].mxu0 }
 0x4d4   : > { %v762_v38 = vadd.f32 %v1533_v33, %v761_v37  ;;  %767 = vadd.xlane.f32.xlu0 %v759_v35  ;;  %v1692_v39 = vpop.f32.mrb[7].mxu0  ;;  %v773_v40 = vmul.f32 %v759_v35, %v759_v35  ;;  %v1849_v33 = vld [vmem:[#allocation4 + $0x30] sm:$0xff]  }
 0x4d5   : > { %1726 = vmatpush3.bf16.msra.mxu0 %v1849_v33 }
 0x4d6   : > { %769 = vadd.xlane.f32.xlu1 %v762_v38  ;;  %v774_v41 = vmul.f32 %v762_v38, %v762_v38  ;;  %1727 = vmatprep.subr.bf16.mxu0 %v2004_v0 }
 0x4d8   : > { %775 = vadd.xlane.f32.xlu0 %v773_v40 }
 0x4d9   : > { %1728 = vmatpush3.bf16.msra.mxu0 %v1850_v34 }
 0x4da   : > { %777 = vadd.xlane.f32.xlu1 %v774_v41  ;;  %1753 = vmatprep.subr.bf16.mxu0 %v2004_v0 }
 0x561   : > { %v768_v50 = vpop.xlane.xlu0 %767 }
 0x562   : > { %v771_v51 = vmul.f32 0.03125, %v768_v50 }
 0x563   : > { %v770_v52 = vpop.xlane.xlu1 %769 }
 0x564   : > { %v772_v53 = vmul.f32 0.03125, %v770_v52  ;;  %v781_v55 = vmul.f32 %v771_v51, %v771_v51  ;;  %v785_v1 = vsub.f32 %v759_v35, %v771_v51  ;;  %v1553_v51 = vld [vmem:[%s2422_s8 + $0xa] ss:$0 sm:$0xff] }
 0x565   : > { %v776_v54 = vpop.xlane.xlu0 %775 }
 0x566   : > { %v779_v56 = vmul.f32 0.03125, %v776_v54  ;;  %v782_v58 = vmul.f32 %v772_v53, %v772_v53  ;;  %v786_v4 = vsub.f32 %v762_v38, %v772_v53 }
 0x567   : > { %v778_v57 = vpop.xlane.xlu1 %777 }
 0x568   : > { %v783_v59 = vsub.f32 %v779_v56, %v781_v55  ;;  %v780_v60 = vmul.f32 0.03125, %v778_v57  ;;  %v1554_v55 = vld [vmem:[%s2422_s8 + $0xb] ss:$0 sm:$0xff] }
 0x56a   : > { %v787_v61 = vadd.f32 1e-05, %v783_v59  ;;  %v784_v62 = vsub.f32 %v780_v60, %v782_v58 }
 0x56c   : > { %1875 = vrsqrt.f32 %v787_v61  ;;  %v788_v63 = vadd.f32 1e-05, %v784_v62 }
 0x56e   : > { %1877 = vrsqrt.f32 %v788_v63 }
 0x576   : > { %v1876_v2 = vpop.eup %1875 }
 0x577   : > { %v791_v5 = vmul.f32 %v1876_v2, %v785_v1 }
 0x578   : > { %v1878_v6 = vpop.eup %1877 }
 0x579   : > { %v792_v8 = vmul.f32 %v1878_v6, %v786_v4  ;;  %v797_v9 = vmul.f32 %v1542_v3, %v791_v5 }
 0x57b   : > { %v798_v10 = vmul.f32 %v1542_v3, %v792_v8  ;;  %v803_v11 = vadd.f32 %v1543_v7, %v797_v9  ;;  %v1555_v3 = vld [vmem:[%s2422_s8 + $0xc] ss:$0 sm:$0xff] }
 0x57d   : > { %v804_v12 = vadd.f32 %v1543_v7, %v798_v10  ;;  %v807_v13 = vmul.f32 0.02, %v803_v11  ;;  %vm805_vm6 = vcmp.ge.f32.partialorder %v803_v11, 0.0 }
 0x57f   : > { %vm806_vm7 = vcmp.ge.f32.partialorder %v804_v12, 0.0  ;;  %v808_v14 = vmul.f32 0.02, %v804_v12  ;;  %v809_v15 = vsel %vm805_vm6, %v803_v11, %v807_v13  ;;  %v1852_v13 = vld [vmem:[#allocation6 + $0x8] sm:$0xff]  }
 0x581   : > { %v810_v16 = vsel %vm806_vm7, %v804_v12, %v808_v14  ;;  %v1851_v12 = vld [vmem:[#allocation6] sm:$0xff]   ;;  %v1853_v14 = vld [vmem:[#allocation6 + $0x10] sm:$0xff]  }
 0x582   : > { %v828_v17 = vpack.c.bf16 %v810_v16, %v809_v15  ;;  %v1854_v15 = vld [vmem:[#allocation6 + $0x18] sm:$0xff]   ;;  %v1855_v16 = vld [vmem:[#allocation6 + $0x20] sm:$0xff]  }
 0x584   : > { %1710 = vmatmul.mubr.bf16.vlgmr.msra.gmra.mrb[4].mxu1 %v828_v17  ;;  %v1856_v17 = vld [vmem:[#allocation6 + $0x28] sm:$0xff]  }
 0x585   : > { %1749 = vmatprep.mubr.msk.bf16.mxu1 %vm2005_vm0, %v2004_v0  ;;  %1734 = vmatpush3.bf16.msra.mxu1 %v1851_v12 }
 0x586   : > { %1735 = vmatprep.subr.bf16.mxu1 %v2004_v0 }
 0x589   : > { %1736 = vmatpush3.bf16.msra.mxu1 %v1852_v13 }
 0x58a   : > { %1737 = vmatprep.subr.bf16.mxu1 %v2004_v0 }
 0x58d   : > { %1738 = vmatpush3.bf16.msra.mxu1 %v1853_v14 }
 0x58e   : > { %1739 = vmatprep.subr.bf16.mxu1 %v2004_v0 }
 0x591   : > { %1740 = vmatpush3.bf16.msra.mxu1 %v1854_v15 }
 0x592   : > { %1741 = vmatprep.subr.bf16.mxu1 %v2004_v0 }
 0x595   : > { %1742 = vmatpush3.bf16.msra.mxu1 %v1855_v16 }
 0x596   : > { %1743 = vmatprep.subr.bf16.mxu1 %v2004_v0 }
 0x599   : > { %1744 = vmatpush3.bf16.msra.mxu1 %v1856_v17 }
 0x59a   : > { %1745 = vmatprep.subr.bf16.mxu1 %v2004_v0 }
 0x657   : > { %v915_v19 = vpop.f32.mrb[4].mxu1 }
 0x658   : > { %v916_v20 = vadd.f32 %v1544_v18, %v915_v19  ;;  %v1711_v21 = vpop.f32.mrb[5].mxu1  ;;  %v1858_v19 = vld [vmem:[#allocation6 + $0x38] sm:$0xff]  }
 0x659   : > { %v918_v22 = vpop.f32.mrb[6].mxu1 }
 0x65a   : > { %v919_v23 = vadd.f32 %v1544_v18, %v918_v22  ;;  %924 = vadd.xlane.f32.xlu0 %v916_v20  ;;  %v1712_v24 = vpop.f32.mrb[7].mxu1  ;;  %v930_v25 = vmul.f32 %v916_v20, %v916_v20  ;;  %v1857_v18 = vld [vmem:[#allocation6 + $0x30] sm:$0xff]  }
 0x65b   : > { %1746 = vmatpush3.bf16.msra.mxu1 %v1857_v18  ;;  %v1575_v18 = vld [vmem:[%s2422_s8 + $0x10] ss:$0 sm:$0xff] }
 0x65c   : > { %926 = vadd.xlane.f32.xlu1 %v919_v23  ;;  %v931_v26 = vmul.f32 %v919_v23, %v919_v23  ;;  %1747 = vmatprep.subr.bf16.mxu1 %v2004_v0 }
 0x65e   : > { %932 = vadd.xlane.f32.xlu0 %v930_v25 }
 0x65f   : > { %1748 = vmatpush3.bf16.msra.mxu1 %v1858_v19 }
 0x660   : > { %934 = vadd.xlane.f32.xlu1 %v931_v26 }
 0x6e7   : > { %v925_v35 = vpop.xlane.xlu0 %924 }
 0x6e8   : > { %v928_v36 = vmul.f32 0.03125, %v925_v35 }
 0x6e9   : > { %v927_v37 = vpop.xlane.xlu1 %926 }
 0x6ea   : > { %v929_v38 = vmul.f32 0.03125, %v927_v37  ;;  %v938_v40 = vmul.f32 %v928_v36, %v928_v36  ;;  %v942_v49 = vsub.f32 %v916_v20, %v928_v36  ;;  %v1564_v36 = vld [vmem:[%s2422_s8 + $0xd] ss:$0 sm:$0xff] }
 0x6eb   : > { %v933_v39 = vpop.xlane.xlu0 %932 }
 0x6ec   : > { %v936_v41 = vmul.f32 0.03125, %v933_v39  ;;  %v939_v43 = vmul.f32 %v929_v38, %v929_v38  ;;  %v943_v52 = vsub.f32 %v919_v23, %v929_v38 }
 0x6ed   : > { %v935_v42 = vpop.xlane.xlu1 %934 }
 0x6ee   : > { %v940_v44 = vsub.f32 %v936_v41, %v938_v40  ;;  %v937_v45 = vmul.f32 0.03125, %v935_v42  ;;  %v1565_v40 = vld [vmem:[%s2422_s8 + $0xe] ss:$0 sm:$0xff] }
 0x6f0   : > { %v944_v46 = vadd.f32 1e-05, %v940_v44  ;;  %v941_v47 = vsub.f32 %v937_v45, %v939_v43 }
 0x6f2   : > { %1879 = vrsqrt.f32 %v944_v46  ;;  %v945_v48 = vadd.f32 1e-05, %v941_v47 }
 0x6f4   : > { %1881 = vrsqrt.f32 %v945_v48 }
 0x6fc   : > { %v1880_v50 = vpop.eup %1879 }
 0x6fd   : > { %v948_v53 = vmul.f32 %v1880_v50, %v942_v49 }
 0x6fe   : > { %v1882_v54 = vpop.eup %1881 }
 0x6ff   : > { %v949_v56 = vmul.f32 %v1882_v54, %v943_v52  ;;  %v954_v57 = vmul.f32 %v1553_v51, %v948_v53 }
 0x701   : > { %v955_v58 = vmul.f32 %v1553_v51, %v949_v56  ;;  %v960_v59 = vadd.f32 %v1554_v55, %v954_v57  ;;  %v1566_v51 = vld [vmem:[%s2422_s8 + $0xf] ss:$0 sm:$0xff] }
 0x703   : > { %v961_v60 = vadd.f32 %v1554_v55, %v955_v58  ;;  %v964_v61 = vmul.f32 0.02, %v960_v59  ;;  %vm962_vm8 = vcmp.ge.f32.partialorder %v960_v59, 0.0  ;;  %v1859_v58 = vld [vmem:[%s2421_s7] sm:$0xff]  }
 0x705   : > { %vm963_vm9 = vcmp.ge.f32.partialorder %v961_v60, 0.0  ;;  %v965_v62 = vmul.f32 0.02, %v961_v60  ;;  %v966_v63 = vsel %vm962_vm8, %v960_v59, %v964_v61 }
 0x707   : > { %v967_v1 = vsel %vm963_vm9, %v961_v60, %v965_v62 }
 0x708   : > { %v985_v2 = vpack.c.bf16 %v967_v1, %v966_v63 }
 0x70a   : > { %1730 = vmatmul.mubr.bf16.vlgmr.msra.gmra.mrb[8].mxu0 %v985_v2 }
 0x70b   : > { %1769 = vmatprep.mubr.msk.bf16.mxu0 %vm2005_vm0, %v2004_v0  ;;  %1754 = vmatpush3.bf16.msra.mxu0 %v1859_v58 }
 0x70c   : > { %1755 = vmatprep.subr.bf16.mxu0 %v2004_v0 }
 0x7dd   : > { %v1072_v4 = vpop.f32.mrb[8].mxu0 }
 0x7de   : > { %v1073_v5 = vadd.f32 %v1555_v3, %v1072_v4  ;;  %v1731_v6 = vpop.f32.mrb[9].mxu0  ;;  %v1860_v4 = vld [vmem:[%s2421_s7 + $0x8] sm:$0xff]  }
 0x7df   : > { %v1075_v7 = vpop.f32.mrb[10].mxu0  ;;  %1756 = vmatpush3.bf16.msra.mxu0 %v1860_v4  ;;  %v1862_v6 = vld [vmem:[%s2421_s7 + $0x18] sm:$0xff]  }
 0x7e0   : > { %v1076_v8 = vadd.f32 %v1555_v3, %v1075_v7  ;;  %1081 = vadd.xlane.f32.xlu0 %v1073_v5  ;;  %v1732_v9 = vpop.f32.mrb[11].mxu0  ;;  %v1087_v10 = vmul.f32 %v1073_v5, %v1073_v5  ;;  %1757 = vmatprep.subr.bf16.mxu0 %v2004_v0  ;;  %v1863_v7 = vld [vmem:[%s2421_s7 + $0x20] sm:$0xff]  }
 0x7e1   : > { %v1865_v9 = vld [vmem:[%s2421_s7 + $0x30] sm:$0xff]  }
 0x7e2   : > { %1083 = vadd.xlane.f32.xlu1 %v1076_v8  ;;  %v1088_v11 = vmul.f32 %v1076_v8, %v1076_v8 }
 0x7e4   : > { %1089 = vadd.xlane.f32.xlu0 %v1087_v10  ;;  %v1866_v10 = vld [vmem:[%s2421_s7 + $0x38] sm:$0xff]  }
 0x7e6   : > { %1091 = vadd.xlane.f32.xlu1 %v1088_v11 }
 0x86d   : > { %v1082_v20 = vpop.xlane.xlu0 %1081 }
 0x86e   : > { %v1085_v21 = vmul.f32 0.015625, %v1082_v20 }
 0x86f   : > { %v1084_v22 = vpop.xlane.xlu1 %1083 }
 0x870   : > { %v1086_v23 = vmul.f32 0.015625, %v1084_v22  ;;  %v1095_v25 = vmul.f32 %v1085_v21, %v1085_v21  ;;  %v1099_v34 = vsub.f32 %v1073_v5, %v1085_v21  ;;  %v1861_v5 = vld [vmem:[%s2421_s7 + $0x10] sm:$0xff]  }
 0x871   : > { %v1090_v24 = vpop.xlane.xlu0 %1089  ;;  %1758 = vmatpush3.bf16.msra.mxu0 %v1861_v5 }
 0x872   : > { %v1093_v26 = vmul.f32 0.015625, %v1090_v24  ;;  %v1096_v28 = vmul.f32 %v1086_v23, %v1086_v23  ;;  %v1100_v37 = vsub.f32 %v1076_v8, %v1086_v23  ;;  %1759 = vmatprep.subr.bf16.mxu0 %v2004_v0  ;;  %v1864_v8 = vld [vmem:[%s2421_s7 + $0x28] sm:$0xff]  }
 0x873   : > { %v1092_v27 = vpop.xlane.xlu1 %1091 }
 0x874   : > { %v1097_v29 = vsub.f32 %v1093_v26, %v1095_v25  ;;  %v1094_v30 = vmul.f32 0.015625, %v1092_v27 }
 0x875   : > { %1760 = vmatpush3.bf16.msra.mxu0 %v1862_v6 }
 0x876   : > { %v1101_v31 = vadd.f32 1e-05, %v1097_v29  ;;  %v1098_v32 = vsub.f32 %v1094_v30, %v1096_v28  ;;  %1761 = vmatprep.subr.bf16.mxu0 %v2004_v0 }
 0x878   : > { %1883 = vrsqrt.f32 %v1101_v31  ;;  %v1102_v33 = vadd.f32 1e-05, %v1098_v32  ;;  %v1577_v31 = vld [vmem:[%s2422_s8 + $0x12] ss:$0 sm:$0xff] }
 0x879   : > { %1762 = vmatpush3.bf16.msra.mxu0 %v1863_v7 }
 0x87a   : > { %1885 = vrsqrt.f32 %v1102_v33  ;;  %1763 = vmatprep.subr.bf16.mxu0 %v2004_v0 }
 0x87d   : > { %1764 = vmatpush3.bf16.msra.mxu0 %v1864_v8 }
 0x87e   : > { %1765 = vmatprep.subr.bf16.mxu0 %v2004_v0 }
 0x881   : > { %1766 = vmatpush3.bf16.msra.mxu0 %v1865_v9 }
 0x882   : > { %v1884_v35 = vpop.eup %1883  ;;  %1767 = vmatprep.subr.bf16.mxu0 %v2004_v0  ;;  %v1576_v0 = vld [vmem:[%s2422_s8 + $0x11] ss:$0 sm:$0xff] }
 0x883   : > { %v1105_v38 = vmul.f32 %v1884_v35, %v1099_v34 }
 0x884   : > { %v1886_v39 = vpop.eup %1885 }
 0x885   : > { %v1106_v41 = vmul.f32 %v1886_v39, %v1100_v37  ;;  %v1111_v42 = vmul.f32 %v1564_v36, %v1105_v38  ;;  %1768 = vmatpush3.bf16.msra.mxu0 %v1866_v10 }
 0x887   : > { %v1112_v43 = vmul.f32 %v1564_v36, %v1106_v41  ;;  %v1117_v44 = vadd.f32 %v1565_v40, %v1111_v42 }
 0x889   : > { %v1118_v45 = vadd.f32 %v1565_v40, %v1112_v43  ;;  %v1121_v46 = vmul.f32 0.02, %v1117_v44  ;;  %vm1119_vm10 = vcmp.ge.f32.partialorder %v1117_v44, 0.0 }
 0x88b   : > { %vm1120_vm11 = vcmp.ge.f32.partialorder %v1118_v45, 0.0  ;;  %v1122_v47 = vmul.f32 0.02, %v1118_v45  ;;  %v1123_v48 = vsel %vm1119_vm10, %v1117_v44, %v1121_v46 }
 0x88d   : > { %v1124_v49 = vsel %vm1120_vm11, %v1118_v45, %v1122_v47 }
 0x88e   : > { %v1142_v50 = vpack.c.bf16 %v1124_v49, %v1123_v48 }
 0x890   : > { %1750 = vmatmul.mubr.bf16.vlgmr.msra.gmra.mrb[8].mxu1 %v1142_v50 }
 0x963   : > { %v1229_v52 = vpop.f32.mrb[8].mxu1 }
 0x964   : > { %v1230_v53 = vadd.f32 %v1566_v51, %v1229_v52  ;;  %v1751_v54 = vpop.f32.mrb[9].mxu1 }
 0x965   : > { %v1232_v55 = vpop.f32.mrb[10].mxu1 }
 0x966   : > { %v1233_v56 = vadd.f32 %v1566_v51, %v1232_v55  ;;  %1238 = vadd.xlane.f32.xlu0 %v1230_v53  ;;  %v1752_v57 = vpop.f32.mrb[11].mxu1 }
 0x968   : > { %1240 = vadd.xlane.f32.xlu1 %v1233_v56 }
 0x9f3   : > { %v1239_v59 = vpop.xlane.xlu0 %1238 }
 0x9f4   : > { %v1242_v60 = vmul.f32 0.0078125, %v1239_v59 }
 0x9f5   : > { %v1241_v61 = vpop.xlane.xlu1 %1240 }
 0x9f6   : > { %v1244_v62 = vsub.f32 %v1230_v53, %v1242_v60  ;;  %v1243_v63 = vmul.f32 0.0078125, %v1241_v61 }
 0x9f8   : > { %v1245_v1 = vsub.f32 %v1233_v56, %v1243_v63  ;;  %v1246_v2 = vmul.f32 %v1244_v62, %v1244_v62 }
 0x9fa   : > { %1248 = vadd.xlane.f32.xlu0 %v1246_v2  ;;  %v1247_v3 = vmul.f32 %v1245_v1, %v1245_v1 }
 0x9fc   : > { %1250 = vadd.xlane.f32.xlu1 %v1247_v3 }
 0xa87   : > { %v1249_v11 = vpop.xlane.xlu0 %1248 }
 0xa88   : > { %v1252_v12 = vmul.f32 0.0078125, %v1249_v11 }
 0xa89   : > { %v1251_v13 = vpop.xlane.xlu1 %1250 }
 0xa8a   : > { %v1254_v14 = vadd.f32 1e-05, %v1252_v12  ;;  %v1253_v15 = vmul.f32 0.0078125, %v1251_v13 }
 0xa8c   : > { %1887 = vrsqrt.f32 %v1254_v14  ;;  %v1255_v16 = vadd.f32 1e-05, %v1253_v15 }
 0xa8e   : > { %1889 = vrsqrt.f32 %v1255_v16 }
 0xa96   : > { %v1888_v17 = vpop.eup %1887 }
 0xa97   : > { %v1258_v19 = vmul.f32 %v1888_v17, %v1244_v62 }
 0xa98   : > { %v1890_v20 = vpop.eup %1889 }
 0xa99   : > { %v1264_v21 = vmul.f32 %v1575_v18, %v1258_v19  ;;  %v1259_v22 = vmul.f32 %v1890_v20, %v1245_v1 }
 0xa9b   : > { %v1265_v23 = vmul.f32 %v1575_v18, %v1259_v22  ;;  %v1270_v24 = vadd.f32 %v1576_v0, %v1264_v21 }
 0xa9d   : > { %v1271_v25 = vadd.f32 %v1576_v0, %v1265_v23  ;;  %v1274_v26 = vmul.f32 0.02, %v1270_v24  ;;  %vm1272_vm12 = vcmp.ge.f32.partialorder %v1270_v24, 0.0 }
 0xa9f   : > { %vm1273_vm13 = vcmp.ge.f32.partialorder %v1271_v25, 0.0  ;;  %v1275_v27 = vmul.f32 0.02, %v1271_v25  ;;  %v1276_v28 = vsel %vm1272_vm12, %v1270_v24, %v1274_v26 }
 0xaa1   : > { %v1277_v29 = vsel %vm1273_vm13, %v1271_v25, %v1275_v27 }
 0xaa2   : > { %v1295_v30 = vpack.c.bf16 %v1277_v29, %v1276_v28 }
 0xaa4   : > { %1770 = vmatmul.mubr.bf16.vlgmr.msra.gmra.mrb[12].mxu0 %v1295_v30 }
 0xb77   : > { %v1382_v32 = vpop.f32.mrb[12].mxu0 }
 0xb78   : > { %v1383_v33 = vadd.f32 %v1577_v31, %v1382_v32  ;;  %v1771_v34 = vpop.f32.mrb[13].mxu0 }
 0xb79   : > { %v1385_v35 = vpop.f32.mrb[14].mxu0 }
 0xb7a   : > { %v1386_v36 = vadd.f32 %v1577_v31, %v1385_v35  ;;  %v1772_v37 = vpop.f32.mrb[15].mxu0  ;;  %v1389_v38 = vsel %vm409_vm1, %v1383_v33, -inf }
 0xb7b   : > { %1390 = vmax.xlane.f32.xlu0 %v1389_v38 }
 0xb7c   : > { %v1392_v39 = vsel %vm409_vm1, %v1386_v36, -inf }
 0xb7d   : > { %1393 = vmax.xlane.f32.xlu1 %v1392_v39 }
 0xc08   : > { %v1391_v40 = vpop.xlane.xlu0 %1390 }
 0xc09   : > { %v1395_v41 = vsub.f32 %v1383_v33, %v1391_v40 }
 0xc0a   : > { %v1394_v42 = vpop.xlane.xlu1 %1393 }
 0xc0b   : > { %v1397_v43 = vmul.f32 1.442695, %v1395_v41  ;;  %v1396_v44 = vsub.f32 %v1386_v36, %v1394_v42 }
 0xc0d   : > { %1891 = vpow2.f32 %v1397_v43  ;;  %v1399_v45 = vmul.f32 1.442695, %v1396_v44 }
 0xc0f   : > { %1893 = vpow2.f32 %v1399_v45 }
 0xc17   : > { %v1892_v46 = vpop.eup %1891 }
 0xc18   : > { %v1401_v47 = vsel %vm409_vm1, %v1892_v46, 0.0 }
 0xc19   : > { %v1894_v48 = vpop.eup %1893  ;;  %1402 = vadd.xlane.f32.xlu0 %v1401_v47 }
 0xc1a   : > { %v1404_v49 = vsel %vm409_vm1, %v1894_v48, 0.0 }
 0xc1b   : > { %1405 = vadd.xlane.f32.xlu1 %v1404_v49 }
 0xca6   : > { %v1403_v50 = vpop.xlane.xlu0 %1402 }
 0xca7   : > { %1895 = vrcp.f32 %v1403_v50 }
 0xca8   : > { %v1406_v51 = vpop.xlane.xlu1 %1405 }
 0xca9   : > { %1897 = vrcp.f32 %v1406_v51 }
 0xcb1   : > { %v1896_v52 = vpop.eup %1895 }
 0xcb2   : > { %v1408_v53 = vmul.f32 %v1896_v52, %v1892_v46 }
 0xcb3   : > { %v1898_v54 = vpop.eup %1897 }
 0xcb4   : > { %1411 = vst.msk [vmem:[%s378_s24] sm:$0xff] %vm409_vm1, %v1408_v53  ;;  %v1410_v55 = vmul.f32 %v1898_v54, %v1894_v48 }
 0xcb6   : > { %1412 = vst.msk [vmem:[%s378_s24 + $0x8] sm:$0xff] %vm409_vm1, %v1410_v55 }
 0xcb7 PF: > { %s21_s30 = sadd.s32 1, %s1997_s30  }
 0xcb8   : > { %p18_p3 = scmp.ge.s32.totalorder %s21_s30, 6  }
 0xcba   :  { %20 = sbr.rel (!%p18_p3) target bundleno = 2 (0x2), region = 99 }
 0xcc1   :  { %1435 = vsyncpa [#allocation3], 1 }
 0xcc2   :  { %1437 = vsyncpa [#allocation3 + $0x1], 1 }
 0xcc3   :  { %1438 = vsyncpa [#allocation5], 1 }

</bundles_post_ra>
